<compile_context>
chip_gen: v5e
topology: v5e:2x2
jax: 0.10.0
libtpu: 0.0.40
codegen_flags: <defaults>
</compile_context>

<pallas_src>
import functools

import jax
import jax.numpy as jnp
from jax import lax
from jax.experimental import pallas as pl
from jax.experimental.pallas import tpu as pltpu

LANES = 128
TM_MAX = 4096          # (4096, 128) f32 block = 2 MiB; 2 inputs x 2 buffers = 8 MiB
MIN_BLOCKS = 4         # keep >= 4 grid blocks (megacore on v7x + pipeline depth)
VMEM_LIMIT_BYTES = 48 * 1024 * 1024  # headroom for double buffers + temporaries


def _sublane_multiple(dtype):
    # Minimum second-minor tile multiple per dtype (f32: 8, bf16: 16, int8: 32).
    return max(8, 32 // jnp.dtype(dtype).itemsize)


def _round_up(a, b):
    return ((a + b - 1) // b) * b


def _cdiv(a, b):
    return (a + b - 1) // b


def _tversky_partial_kernel(x_ref, t_ref, o_ref, *, valid_rows_last, needs_mask):
    """Per-block lane-wise partial sums of (p*t, p, t) with p = sigmoid(x)."""
    p = jax.nn.sigmoid(x_ref[...].astype(jnp.float32))
    t = t_ref[...].astype(jnp.float32)

    def write(p_v, t_v):
        # Three direct (1, 128) stores (no sublane concatenate).
        o_ref[0, 0:1, :] = jnp.sum(p_v * t_v, axis=0, keepdims=True)  # sum(p*t)
        o_ref[0, 1:2, :] = jnp.sum(p_v, axis=0, keepdims=True)        # sum(p)
        o_ref[0, 2:3, :] = jnp.sum(t_v, axis=0, keepdims=True)        # sum(t)

    if needs_mask:
        is_last = pl.program_id(0) == pl.num_programs(0) - 1

        @pl.when(jnp.logical_not(is_last))
        def _():
            write(p, t)

        @pl.when(is_last)
        def _():
            # Only the last block pays for the mask. Rows past `valid_rows_last`
            # are out-of-bounds (uninitialized VMEM); zero them BEFORE any
            # arithmetic that feeds the sums. Row-index compare against a
            # static constant: no flattened int32 index, no overflow hazard.
            row = lax.broadcasted_iota(jnp.int32, p.shape, 0)
            valid = row < valid_rows_last
            write(jnp.where(valid, p, 0.0), jnp.where(valid, t, 0.0))
    else:
        write(p, t)


def tversky_loss(inputs, targets, alpha=0.5, beta=0.5, smooth=1.0):
    """Pallas TPU implementation of TverskyLoss.forward (returns a scalar)."""
    x = inputs.reshape(-1)
    t = targets.reshape(-1)
    n = x.shape[0]

    n_main = (n // LANES) * LANES
    rows = n_main // LANES

    # Lane tail (< 128 elements): tiny plain-JAX reduction, no whole-array pad.
    if n_main != n:
        xt = x[n_main:].astype(jnp.float32)
        tt = t[n_main:].astype(jnp.float32)
        pt_tail = jax.nn.sigmoid(xt)
        tail_pt = jnp.sum(pt_tail * tt)
        tail_p = jnp.sum(pt_tail)
        tail_t = jnp.sum(tt)
    else:
        tail_pt = jnp.float32(0.0)
        tail_p = jnp.float32(0.0)
        tail_t = jnp.float32(0.0)

    if rows == 0:
        sum_pt, sum_p, sum_t = tail_pt, tail_p, tail_t
    else:
        mult = max(_sublane_multiple(x.dtype), _sublane_multiple(t.dtype))
        # Biggest tile that (a) keeps >= MIN_BLOCKS blocks when the input is
        # large enough, (b) stays a sublane-tile multiple, (c) caps at TM_MAX.
        tm = min(TM_MAX, max(mult, _round_up(_cdiv(rows, MIN_BLOCKS), mult)))
        num_blocks = _cdiv(rows, tm)
        valid_rows_last = rows - (num_blocks - 1) * tm
        needs_mask = valid_rows_last != tm

        # Free reshape when N % 128 == 0 (the common case).
        # TODO(synk): for lane-unaligned N the prefix slice may still force a
        # copy in XLA; acceptable, and strictly no worse than the old jnp.pad.
        x2 = x[:n_main].reshape(rows, LANES)
        t2 = t[:n_main].reshape(rows, LANES)

        kernel = functools.partial(
            _tversky_partial_kernel,
            valid_rows_last=valid_rows_last,
            needs_mask=needs_mask,
        )

        partials = pl.pallas_call(
            kernel,
            out_shape=jax.ShapeDtypeStruct((num_blocks, 3, LANES), jnp.float32),
            grid=(num_blocks,),
            in_specs=[
                pl.BlockSpec((tm, LANES), lambda i: (i, 0)),
                pl.BlockSpec((tm, LANES), lambda i: (i, 0)),
            ],
            out_specs=pl.BlockSpec((1, 3, LANES), lambda i: (i, 0, 0)),
            compiler_params=pltpu.CompilerParams(
                dimension_semantics=("parallel",),  # independent blocks -> megacore OK
                vmem_limit_bytes=VMEM_LIMIT_BYTES,
            ),
        )(x2, t2)

        # Tiny final combine in JAX: (num_blocks, 3, 128) -> (3,)
        sums = jnp.sum(partials, axis=(0, 2))
        sum_pt = sums[0] + tail_pt
        sum_p = sums[1] + tail_p
        sum_t = sums[2] + tail_t

    tp = sum_pt
    fp = sum_p - tp   # sum((1 - t) * p)
    fn = sum_t - tp   # sum(t * (1 - p))
    alpha = jnp.float32(alpha)
    beta = jnp.float32(beta)
    smooth = jnp.float32(smooth)
    return 1.0 - (tp + smooth) / (tp + alpha * fp + beta * fn + smooth)


def _reference(inputs, targets, alpha=0.5, beta=0.5, smooth=1.0):
    p = jax.nn.sigmoid(inputs.astype(jnp.float32)).reshape(-1)
    t = targets.astype(jnp.float32).reshape(-1)
    tp = jnp.sum(p * t)
    fp = jnp.sum((1.0 - t) * p)
    fn = jnp.sum(t * (1.0 - p))
    return 1.0 - (tp + smooth) / (tp + alpha * fp + beta * fn + smooth)


if __name__ == "__main__":
    key = jax.random.PRNGKey(0)
    keys = jax.random.split(key, 8)

    def check(x, tgt, **kw):
        loss = tversky_loss(x, tgt, **kw)
        jax.block_until_ready(loss)
        ref = _reference(x, tgt, **kw)
        assert jnp.allclose(loss, ref, atol=1e-5, rtol=1e-5), (loss, ref)

    # PyTorch-style NCHW logits and binary targets (lane-aligned, no mask path).
    x = jax.random.normal(keys[0], (2, 4, 16, 16), dtype=jnp.float32)
    tgt = (jax.random.uniform(keys[1], (2, 4, 16, 16)) > 0.5).astype(jnp.float32)
    check(x, tgt)
    check(x, tgt, alpha=0.7, beta=0.3, smooth=0.5)

    # rows not a multiple of the tile -> exercises the gated last-block row mask.
    xm = jax.random.normal(keys[2], (1, 1, 130, 128), dtype=jnp.float32)
    tm_ = (jax.random.uniform(keys[3], (1, 1, 130, 128)) > 0.5).astype(jnp.float32)
    check(xm, tm_)

    # N % 128 != 0 and N > 128 -> exercises plain-JAX lane tail + kernel.
    xr = jax.random.normal(keys[4], (2, 3, 7, 5), dtype=jnp.float32)
    tr = (jax.random.uniform(keys[5], (2, 3, 7, 5)) > 0.5).astype(jnp.float32)
    check(xr, tr)

    # N < 128 -> pure plain-JAX fallback path.
    xs = jax.random.normal(keys[6], (1, 3, 7, 5), dtype=jnp.float32)
    ts = (jax.random.uniform(keys[7], (1, 3, 7, 5)) > 0.5).astype(jnp.float32)
    check(xs, ts)

    # bf16 logits / targets (kernel upcasts in VMEM; halves HBM traffic).
    check(x.astype(jnp.bfloat16), tgt.astype(jnp.bfloat16))

    print("KERNEL_OK")
</pallas_src>

<mosaic_0001>
module attributes {stable_mosaic.version = 11 : i64} {
  func.func @_tversky_partial_kernel(%arg0: i32, %arg1: memref<8x128xf32, #tpu.memory_space<vmem>>, %arg2: memref<8x128xf32, #tpu.memory_space<vmem>>, %arg3: memref<1x3x128xf32, #tpu.memory_space<vmem>>) attributes {dimension_semantics = [#tpu.dimension_semantics<parallel>], iteration_bounds = array<i64: 2>, scalar_prefetch = 0 : i64, scratch_operands = 0 : i64, tpu.core_type = #tpu.core_type<tc>, window_params = [{transform_indices = @transform_0, window_bounds = array<i64: 8, 128>}, {transform_indices = @transform_1, window_bounds = array<i64: 8, 128>}, {transform_indices = @transform_2, window_bounds = array<i64: 1, 3, 128>}]} {
    %c0 = arith.constant 0 : index
    %c0_0 = arith.constant 0 : index
    %0 = vector.load %arg1[%c0, %c0_0] : memref<8x128xf32, #tpu.memory_space<vmem>>, vector<8x128xf32>
    %1 = arith.negf %0 : vector<8x128xf32>
    %2 = math.exp %1 : vector<8x128xf32>
    %cst = arith.constant 1.000000e+00 : f32
    %3 = vector.broadcast %cst : f32 to vector<8x128xf32>
    %4 = arith.addf %3, %2 : vector<8x128xf32>
    %5 = arith.divf %3, %4 : vector<8x128xf32>
    %c0_1 = arith.constant 0 : index
    %c0_2 = arith.constant 0 : index
    %6 = vector.load %arg2[%c0_1, %c0_2] : memref<8x128xf32, #tpu.memory_space<vmem>>, vector<8x128xf32>
    %7 = arith.mulf %5, %6 : vector<8x128xf32>
    %cst_3 = arith.constant dense<0.000000e+00> : vector<128xf32>
    %8 = vector.multi_reduction <add>, %7, %cst_3 [0] : vector<8x128xf32> to vector<128xf32>
    %9 = vector.shape_cast %8 : vector<128xf32> to vector<1x128xf32>
    %c0_4 = arith.constant 0 : index
    %c0_5 = arith.constant 0 : index
    %c0_6 = arith.constant 0 : index
    %10 = vector.load %arg3[%c0_4, %c0_5, %c0_6] : memref<1x3x128xf32, #tpu.memory_space<vmem>>, vector<1x1x128xf32>
    %11 = vector.shape_cast %10 : vector<1x1x128xf32> to vector<1x128xf32>
    %12 = vector.shape_cast %9 : vector<1x128xf32> to vector<1x1x128xf32>
    tpu.vector_store %arg3[%c0_4, %c0_5, %c0_6], %12 {strides = array<i32>} : memref<1x3x128xf32, #tpu.memory_space<vmem>>, vector<1x1x128xf32>,
    %cst_7 = arith.constant dense<0.000000e+00> : vector<128xf32>
    %13 = vector.multi_reduction <add>, %5, %cst_7 [0] : vector<8x128xf32> to vector<128xf32>
    %14 = vector.shape_cast %13 : vector<128xf32> to vector<1x128xf32>
    %c0_8 = arith.constant 0 : index
    %c1 = arith.constant 1 : index
    %c0_9 = arith.constant 0 : index
    %15 = vector.load %arg3[%c0_8, %c1, %c0_9] : memref<1x3x128xf32, #tpu.memory_space<vmem>>, vector<1x1x128xf32>
    %16 = vector.shape_cast %15 : vector<1x1x128xf32> to vector<1x128xf32>
    %17 = vector.shape_cast %14 : vector<1x128xf32> to vector<1x1x128xf32>
    tpu.vector_store %arg3[%c0_8, %c1, %c0_9], %17 {strides = array<i32>} : memref<1x3x128xf32, #tpu.memory_space<vmem>>, vector<1x1x128xf32>,
    %cst_10 = arith.constant dense<0.000000e+00> : vector<128xf32>
    %18 = vector.multi_reduction <add>, %6, %cst_10 [0] : vector<8x128xf32> to vector<128xf32>
    %19 = vector.shape_cast %18 : vector<128xf32> to vector<1x128xf32>
    %c0_11 = arith.constant 0 : index
    %c2 = arith.constant 2 : index
    %c0_12 = arith.constant 0 : index
    %20 = vector.load %arg3[%c0_11, %c2, %c0_12] : memref<1x3x128xf32, #tpu.memory_space<vmem>>, vector<1x1x128xf32>
    %21 = vector.shape_cast %20 : vector<1x1x128xf32> to vector<1x128xf32>
    %22 = vector.shape_cast %19 : vector<1x128xf32> to vector<1x1x128xf32>
    tpu.vector_store %arg3[%c0_11, %c2, %c0_12], %22 {strides = array<i32>} : memref<1x3x128xf32, #tpu.memory_space<vmem>>, vector<1x1x128xf32>,
    return
  }
  func.func @transform_0(%arg0: i32) -> (i32, i32) {
    %c0_i32 = arith.constant 0 : i32
    %c0_i32_0 = arith.constant 0 : i32
    return %arg0, %c0_i32 : i32, i32
  }
  func.func @transform_1(%arg0: i32) -> (i32, i32) {
    %c0_i32 = arith.constant 0 : i32
    %c0_i32_0 = arith.constant 0 : i32
    return %arg0, %c0_i32 : i32, i32
  }
  func.func @transform_2(%arg0: i32) -> (i32, i32, i32) {
    %c0_i32 = arith.constant 0 : i32
    %c0_i32_0 = arith.constant 0 : i32
    %c0_i32_1 = arith.constant 0 : i32
    return %arg0, %c0_i32, %c0_i32_0 : i32, i32, i32
  }
}

</mosaic_0001>

<bundles_post_ra>
// kernel: tpu_custom_call.1
= control target key start
LH: loop header
LB: loop body
LE: loop exit
PB: predicated region body
PF: predicated region fallthrough
CT: control target
= control target key end

     0   :  { %7 = vsyncpa [#allocation3], 0  ;;  %s639_s0 = inlined_call_operand.hbm [shape: f32[16,128], index: 0, kind: input, shape index: {}]   ;;  %s640_s1 = inlined_call_operand.hbm [shape: f32[16,128], index: 1, kind: input, shape index: {}]   ;;  %s641_s2 = inlined_call_operand.vmem [shape: f32[2,3,128], index: 2, kind: output, shape index: {}]  }
   0x1   :  { %9 = vsyncpa [#allocation3 + $0x1], 0 }
   0x2   :  { %10 = vsyncpa [#allocation5], 0 }
   0x3   :  { %12 = vsyncpa [#allocation5 + $0x1], 0  ;;  %s508_s9 = smov 0   ;;  %s510_s10 = smov 0  }
   0x4   :  { %s512_s11 = smov 0   ;;  %s514_s12 = smov 0  }
   0x5 LB: > { %s527_s13 = sadd.s32 4294967295, %s491_s12   ;;  %s530_s14 = sadd.s32 1, %s491_s12   ;;  %s491_s12 = sphi %s514_s12, %s649_s12   ;;  %s487_s11 = sphi %s512_s11, %s648_s11   ;;  %s483_s10 = sphi %s510_s10, %s647_s10   ;;  %s479_s9 = sphi %s508_s9, %s646_s9  }
   0x6   : > { %s22_s15 = ssub.s32 %s491_s12, %s530_s14  ;;  %s25_s16 = sadd.s32 1, %s487_s11 }
   0x7   : > { %p23_p0 = scmp.eq.s32.totalorder %s22_s15, 0  ;;  %p32_p1 = scmp.ne.s32.totalorder %s487_s11, %s483_s10 }
   0x8   : > { %p33_p2 = scmp.eq.s32.totalorder %s491_s12, 0  ;;  %p38_p3 = scmp.ne.s32.totalorder %s483_s10, %s479_s9 }
   0x9   : > { %s540_s17 = scalar_select %p23_p0, %s487_s11, %s25_s16  }
   0xa   : > { %p542_p4 = por %p33_p2, %p32_p1  ;;  %p39_p5 = scmp.eq.s32.totalorder %s527_s13, 0 }
   0xb   : > { %p356_p6 = scmp.lt.s32.totalorder %s491_s12, 2  ;;  %s553_s20 = sand.u32 1, %s487_s11  }
   0xc   : > { %p548_p7 = por %p39_p5, %p38_p3  ;;  %s334_s21 = sshll.u32 %s553_s20, 3 }
   0xd   : > { %s335_s22 = sshll.u32 %s491_s12, 3  ;;  %s118_s26 = scalar_lea.vmem [#allocation2], %s334_s21 }
   0xe   : > { %s122_s25 = scalar_lea.hbm %s639_s0, %s335_s22  ;;  %s126_s27 = sshll.u32 %s118_s26, 4  ;;  %s127_s27 = int_to_ptr.vmem [resolvable:$true] %s126_s27 }
   0xf   : > { %s124_s28 = sshll.u32 %s122_s25, 4  ;;  %p562_p8 = pnand %p356_p6, %p542_p4  ;;  %s125_s28 = int_to_ptr.hbm [resolvable:$true] %s124_s28 }
  0x10   : > { %p338_p9 = scmp.ge.s32.totalorder %s491_s12, 1  ;;  %p150_p10 = scmp.lt.s32.totalorder %s491_s12, 3 }
  0x11   : > { %s115_s30 = scalar_lea.sflag [#allocation3], %s553_s20  ;;  %s393_s3 = sshra.s32 %s125_s28, 4  ;;  %s394_s3 = int_to_ptr.hbm [resolvable:$true] %s393_s3 }
  0x12   : > { %s395_s4 = scalar_lea.hbm %s394_s3, 8  ;;  %p397_p12 = pneg %p562_p8 }
  0x13   : > { %p396_p11 = scmp.ne.s32.totalorder %s394_s3, %s395_s4  ;;  %s400_s7 = scalar_lea.hbm %s639_s0, 16 }
  0x14   : > { %p401_p1 = scmp.lt.s32.totalorder %s394_s3, %s639_s0  ;;  %p402_p2 = scmp.lt.s32.totalorder %s400_s7, %s395_s4 }
  0x15   : > { %p398_p13 = pnand %p397_p12, %p396_p11 }
  0x16   : > { %p403_p3 = por %p402_p2, %p401_p1 }
  0x17   : > { %p399_p0 = pneg %p398_p13 }
  0x19   : > { %p404_p4 = pnand %p403_p3, %p399_p0 }
  0x1b   : > { %407 = shalt.err (!%p404_p4)
}
  0x1c   : > { %352 = dma.hbm_to_vmem [thread:$0]  (!%p562_p8), %s125_s28, 128, %s127_s27, %s115_s30  }
  0x1d   : > { %p586_p5 = pnand %p338_p9, %p150_p10  ;;  %s141_s23 = scalar_lea.hbm %s640_s1, %s335_s22 }
  0x1e   : > { %s137_s24 = scalar_lea.vmem [#allocation4], %s334_s21  ;;  %s143_s26 = sshll.u32 %s141_s23, 4  ;;  %s144_s26 = int_to_ptr.hbm [resolvable:$true] %s143_s26 }
  0x1f   : > { %s145_s25 = sshll.u32 %s137_s24, 4  ;;  %s134_s3 = scalar_lea.sflag [#allocation5], %s553_s20  ;;  %s146_s25 = int_to_ptr.vmem [resolvable:$true] %s145_s25 }
  0x20   : > { %s423_s4 = sshra.s32 %s144_s26, 4  ;;  %s430_s28 = scalar_lea.hbm %s640_s1, 16  ;;  %s424_s4 = int_to_ptr.hbm [resolvable:$true] %s423_s4 }
  0x21   : > { %s425_s5 = scalar_lea.hbm %s424_s4, 8  ;;  %p431_p11 = scmp.lt.s32.totalorder %s424_s4, %s640_s1 }
  0x22   : > { %p426_p6 = scmp.ne.s32.totalorder %s424_s4, %s425_s5  ;;  %p432_p13 = scmp.lt.s32.totalorder %s430_s28, %s425_s5 }
  0x24   : > { %p428_p9 = pnand %p426_p6, %p397_p12  ;;  %p433_p0 = por %p432_p13, %p431_p11 }
  0x26   : > { %p429_p10 = pneg %p428_p9 }
  0x28   : > { %p434_p1 = pnand %p433_p0, %p429_p10 }
  0x2a   : > { %437 = shalt.err (!%p434_p1)
}
  0x2b   : > { %355 = dma.hbm_to_vmem [thread:$0]  (!%p562_p8), %s144_s26, 128, %s146_s25, %s134_s3  }
  0x2c   : > { %154 = sbr.rel (%p586_p5) target bundleno = 96 (0x60), region = 28  ;;  %s156_s20 = sand.u32 (!%p586_p5), 1, %s483_s10  }
  0x2d   : > { %s339_s21 = sshll.u32 (!%p586_p5), %s156_s20, 3  ;;  %s157_s6 = scalar_lea.sflag (!%p586_p5), [#allocation3], %s156_s20 }
  0x2e   : > { %s160_s7 = scalar_lea.vmem (!%p586_p5), [#allocation2], %s339_s21 }
  0x31   : > { %470 = dma.done.wait (%p548_p7), %s157_s6, 128  }
  0x32   : > { %472 = vsyncadd (%p548_p7), %s157_s6, 4294967168  ;;  %s167_s8 = scalar_lea.sflag [#allocation5], %s156_s20  ;;  %s170_s9 = scalar_lea.vmem [#allocation4], %s339_s21 }
  0x33   : > { %474 = dma.done.wait (%p548_p7), %s167_s8, 128  }
  0x34   : > { %476 = vsyncadd (%p548_p7), %s167_s8, 4294967168  ;;  %p196_p8 = scmp.lt.s32.totalorder %s527_s13, 1  ;;  %v200_v0 = vld [vmem:[%s160_s7] sm:$0xff]  ;;  %v220_v1 = vld [vmem:[%s170_s9] sm:$0xff] }
  0x35   : > { %v342_v2 = vmul.f32 -1.442695, %v200_v0  ;;  %v236_v3 = vrot.slane %v220_v1, 4 }
  0x36   : > { %s651_s13 = smov (!%p196_p8, %s527_s13), 1 }
  0x37   : > { %389 = vpow2.f32 %v342_v2  ;;  %v237_v4 = vadd.f32 %v236_v3, %v220_v1  ;;  %s341_s29 = sshll.u32 %s651_s13, 2 }
  0x38   : > { %s621_s19 = scalar_lea.vmem %s641_s2, %s341_s29 }
  0x39   : > { %v238_v5 = vrot.slane %v237_v4, 2 }
  0x3b   : > { %v239_v6 = vadd.f32 %v238_v5, %v237_v4 }
  0x3d   : > { %v390_v7 = vpop.eup %389  ;;  %v240_v8 = vrot.slane %v239_v6, 1 }
  0x3e   : > { %v204_v9 = vadd.f32 1.0, %v390_v7 }
  0x3f   : > { %v241_v10 = vadd.f32 %v240_v8, %v239_v6 }
  0x40   : > { %391 = vrcp.f32 %v204_v9  ;;  %v216_v13 = vand.u32 2147483648, %v204_v9  ;;  %vm210_vm0 = vweird.f32 %v204_v9  ;;  %v214_v15 = vand.u32 2147483647, %v204_v9 }
  0x41   : > { %242 = vst [vmem:[%s621_s19 + $0x2] sm:$0x1] %v241_v10 }
  0x42   : > { %v217_v17 = vor.u32 1.1754944e-38, %v216_v13  ;;  %vm215_vm3 = vcmp.eq.f32.partialorder %v214_v15, 8.507059e+37 }
  0x46   : > { %v392_v11 = vpop.eup %391 }
  0x47   : > { %v206_v12 = vmul.f32 %v392_v11, %v204_v9  ;;  %vm211_vm1 = vweird.f32 %v392_v11 }
  0x48   : > { %vm212_vm2 = vmor %vm210_vm0, %vm211_vm1 }
  0x49   : > { %v207_v14 = vsub.f32 1.0, %v206_v12 }
  0x4b   : > { %v208_v16 = vmul.f32 %v392_v11, %v207_v14 }
  0x4d   : > { %v209_v18 = vadd.f32 %v392_v11, %v208_v16 }
  0x4f   : > { %v213_v19 = vsel %vm212_vm2, %v392_v11, %v209_v18 }
  0x50   : > { %v218_v20 = vsel %vm215_vm3, %v217_v17, %v213_v19 }
  0x51   : > { %v221_v21 = vmul.f32 %v220_v1, %v218_v20  ;;  %v229_v22 = vrot.slane %v218_v20, 4 }
  0x53   : > { %v222_v23 = vrot.slane %v221_v21, 4  ;;  %v230_v24 = vadd.f32 %v229_v22, %v218_v20 }
  0x55   : > { %v223_v25 = vadd.f32 %v222_v23, %v221_v21  ;;  %v231_v26 = vrot.slane %v230_v24, 2 }
  0x57   : > { %v224_v27 = vrot.slane %v223_v25, 2  ;;  %v232_v28 = vadd.f32 %v231_v26, %v230_v24 }
  0x59   : > { %v225_v29 = vadd.f32 %v224_v27, %v223_v25  ;;  %v233_v30 = vrot.slane %v232_v28, 1 }
  0x5b   : > { %v226_v31 = vrot.slane %v225_v29, 1  ;;  %v234_v32 = vadd.f32 %v233_v30, %v232_v28 }
  0x5d   : > { %v227_v33 = vadd.f32 %v226_v31, %v225_v29  ;;  %235 = vst [vmem:[%s621_s19 + $0x1] sm:$0x1] %v234_v32 }
  0x5f   : > { %228 = vst [vmem:[%s621_s19] sm:$0x1] %v227_v33 }
  0x60 PF: > { %p15_p7 = scmp.ge.s32.totalorder %s530_s14, 4   ;;  %s646_s9 = smov %s483_s10 }
  0x61   : > { %s647_s10 = smov %s487_s11  ;;  %s648_s11 = smov %s540_s17 }
  0x62   : > { %s649_s12 = smov %s530_s14  ;;  %17 = sbr.rel (!%p15_p7) target bundleno = 5 (0x5), region = 81 }
  0x67   :  { %262 = vsyncpa [#allocation3], 1 }
  0x68   :  { %264 = vsyncpa [#allocation3 + $0x1], 1 }
  0x69   :  { %265 = vsyncpa [#allocation5], 1 }
  0x6a   :  { %267 = vsyncpa [#allocation5 + $0x1], 1 }

</bundles_post_ra>
